<compile_context>
chip_gen: v7x
topology: tpu7x:2x2x1
jax: 0.10.0
libtpu: 0.0.40
codegen_flags: <defaults>
</compile_context>

<pallas_src>
import functools
import math

import jax
import jax.numpy as jnp
from jax.experimental import pallas as pl
from jax.experimental.pallas import tpu as pltpu

DLINEAR_KERNEL_SIZE = 25  # LTSF-Linear default moving-average window


# ---------------------------------------------------------------------------
# Parameter-prep time: algebraic folding + block/Kronecker weight expansion
# ---------------------------------------------------------------------------
def moving_average_matrix(seq_len, kernel_size, dtype=jnp.float32):
    """A[L, L] such that trend = A @ x reproduces torch moving_avg
    (replicate-pad both ends by (K-1)//2, AvgPool1d(K, stride=1))."""
    pad = (kernel_size - 1) // 2
    idx = jnp.arange(seq_len)[:, None] + jnp.arange(kernel_size)[None, :] - pad
    idx = jnp.clip(idx, 0, seq_len - 1)                      # [L, K]
    onehot = jax.nn.one_hot(idx, seq_len, dtype=dtype)       # [L, K, L]
    return onehot.sum(axis=1) / float(kernel_size)           # [L, L]


def fold_params(params, *, model_type, individual, seq_len, kernel_size):
    """Fold the DLinear decomposition / NLinear offset into one effective (W, b)."""
    if model_type == "dlinear":
        ws, bs, wt, bt = params
        a = moving_average_matrix(seq_len, kernel_size)
        res = jnp.eye(seq_len, dtype=jnp.float32) - a        # seasonal projector (I - A)
        if individual:
            w = jnp.einsum("dpl,lm->dpm", ws, res) + jnp.einsum("dpl,lm->dpm", wt, a)
        else:
            w = ws @ res + wt @ a
        b = bs + bt
    elif model_type == "nlinear":
        w, b = params
        row_sum = w.sum(axis=-1)
        # y = W(x - x_last) + b + x_last  ==  W' x + b, with W'[:, L-1] += (1 - sum_l W)
        if individual:
            w = w.at[:, :, -1].add(1.0 - row_sum)
        else:
            w = w.at[:, -1].add(1.0 - row_sum)
    else:  # "linear"
        w, b = params
    return w, b


def prepare_kernel_params(
    params,
    *,
    model_type,
    individual,
    seq_len,
    pred_len,
    n_ch,
    kernel_size=DLINEAR_KERNEL_SIZE,
    param_dtype=jnp.float32,
):
    """One-time prep: fold (DLinear/NLinear) and expand to block/Kronecker form.

    Returns (w_big[L*D, P*D], b_flat[1, P*D]) such that, with x flattened row-major to
    [B, L*D], the forward is   y_flat = x_flat @ w_big + b_flat   for ALL model variants.
    """
    w, b = fold_params(
        params, model_type=model_type, individual=individual,
        seq_len=seq_len, kernel_size=kernel_size,
    )
    eye = jnp.eye(n_ch, dtype=jnp.float32)
    if individual:
        # w: [D, P, L], b: [P, D]
        w_big = jnp.einsum("dpl,de->lepd", w, eye).reshape(seq_len * n_ch, pred_len * n_ch)
        b_flat = b.reshape(1, pred_len * n_ch)
    else:
        # w: [P, L], b: [P, 1];  w_big[l*D+d', p*D+d] = w[p, l] * delta(d, d')
        w_big = jnp.kron(w.T, eye)                           # [L*D, P*D]
        b_flat = jnp.broadcast_to(b, (pred_len, n_ch)).reshape(1, pred_len * n_ch)
    return w_big.astype(param_dtype), b_flat.astype(jnp.float32)


# ---------------------------------------------------------------------------
# Tile selection (VMEM-budget derived, megacore-aware)
# ---------------------------------------------------------------------------
def _tensorcores_per_chip():
    try:
        kind = jax.devices()[0].device_kind.lower()
    except Exception:
        return 1
    return 2 if ("v7" in kind or "7x" in kind) else 1


def _vmem_budget_bytes():
    cap = 128 << 20
    try:
        info = pltpu.get_tpu_info()
        cap = int(getattr(info, "vmem_capacity_bytes", cap))
    except Exception:
        pass
    # Generous headroom for compiler scratch; stays well under v7x's 64 MiB per TC.
    return min(cap // 2, 40 << 20)


def _choose_batch_tiling(batch, ld, pd, itemsize, weight_bytes):
    """Rows per tile (multiple of 8, or the whole batch) and number of grid steps."""
    budget = _vmem_budget_bytes()
    per_row = 2 * (ld + pd) * itemsize                        # double-buffered x + out rows
    avail = max(budget - weight_bytes - (2 << 20), per_row * 8)
    max_tb = max(8, (avail // per_row) // 8 * 8)
    # v7x: >=2 parallel tiles so both TensorCores get work; v5e/v6e: fewest steps possible.
    min_tiles = 2 if (_tensorcores_per_chip() >= 2 and batch >= 16) else 1
    num_tiles = max(min_tiles, -(-batch // max_tb))
    if num_tiles <= 1:
        return batch, 1
    tb = -(-batch // num_tiles)
    tb = -(-tb // 8) * 8                                      # sublane-aligned
    if tb >= batch:
        return batch, 1
    return tb, -(-batch // tb)


def _resolve_tiling(batch, ld, pd, itemsize, weight_bytes, num_batch_tiles):
    if num_batch_tiles is None:
        return _choose_batch_tiling(batch, ld, pd, itemsize, weight_bytes)
    num_tiles = max(1, min(int(num_batch_tiles), batch))
    if num_tiles == 1:
        return batch, 1
    tb = -(-batch // num_tiles)
    tb = -(-tb // 8) * 8
    if tb >= batch:
        return batch, 1
    return tb, -(-batch // tb)


# ---------------------------------------------------------------------------
# Kernel: one tile of   y[tb, P*D] = x[tb, L*D] @ W_big[L*D, P*D] + b[1, P*D]
# ---------------------------------------------------------------------------
def _linear_kernel(w_ref, b_ref, x_ref, o_ref):
    y = jnp.dot(x_ref[...], w_ref[...], preferred_element_type=jnp.float32)
    o_ref[...] = (y + b_ref[...]).astype(o_ref.dtype)


# ---------------------------------------------------------------------------
# Forward (Pallas) — mirrors LinearFamilyModel.forward
# ---------------------------------------------------------------------------
@functools.partial(jax.jit, static_argnames=("pred_len", "target_dim", "num_batch_tiles"))
def linear_family_forward(
    past_target,
    past_observed_values,  # unused by the torch forward; kept for signature parity
    kernel_params,         # (w_big, b_flat) from prepare_kernel_params
    *,
    pred_len,
    target_dim,
    num_batch_tiles=None,
):
    del past_observed_values
    w_big, b_flat = kernel_params
    squeeze_channel = target_dim == 1

    if squeeze_channel:
        batch, seq_len = past_target.shape
        n_ch = 1
    else:
        batch, seq_len, n_ch = past_target.shape
    ld = seq_len * n_ch
    pd = pred_len * n_ch

    x_flat = past_target.reshape(batch, ld)   # row-major reshape: free, no HBM pass

    itemsize = past_target.dtype.itemsize
    weight_bytes = w_big.size * w_big.dtype.itemsize
    tb, num_tiles = _resolve_tiling(batch, ld, pd, itemsize, weight_bytes, num_batch_tiles)

    block_bytes = (
        weight_bytes
        + b_flat.size * b_flat.dtype.itemsize
        + 2 * tb * (ld + pd) * itemsize
    )
    vmem_limit = int(min(max(block_bytes + (8 << 20), 16 << 20), 60 << 20))

    out_flat = pl.pallas_call(
        _linear_kernel,
        out_shape=jax.ShapeDtypeStruct((batch, pd), past_target.dtype),
        grid=(num_tiles,),
        in_specs=[
            pl.BlockSpec((ld, pd), lambda i: (0, 0)),   # weight resident across the grid
            pl.BlockSpec((1, pd), lambda i: (0, 0)),    # bias resident
            pl.BlockSpec((tb, ld), lambda i: (i, 0)),   # batch tile of x
        ],
        out_specs=pl.BlockSpec((tb, pd), lambda i: (i, 0)),
        compiler_params=pltpu.CompilerParams(
            dimension_semantics=("parallel",),
            vmem_limit_bytes=vmem_limit,
        ),
    )(w_big, b_flat, x_flat)

    if squeeze_channel:
        preds = out_flat                                   # [B, P]
    else:
        preds = out_flat.reshape(batch, pred_len, n_ch)    # free reshape: [B, P, D]
    return preds[:, None]                                  # preds.unsqueeze(1)


# ---------------------------------------------------------------------------
# Parameters (deterministic synthetic init; shapes mirror nn.Linear(seq_len, pred_len))
# ---------------------------------------------------------------------------
def make_params(key, model_type, seq_len, pred_len, enc_in, individual):
    def one_linear(k):
        kw, kb = jax.random.split(k)
        if individual:
            w = 0.02 * jax.random.normal(kw, (enc_in, pred_len, seq_len), jnp.float32)
            b = 0.02 * jax.random.normal(kb, (pred_len, enc_in), jnp.float32)
        else:
            w = 0.02 * jax.random.normal(kw, (pred_len, seq_len), jnp.float32)
            b = 0.02 * jax.random.normal(kb, (pred_len, 1), jnp.float32)
        return w, b

    if model_type == "dlinear":
        k1, k2 = jax.random.split(key)
        ws, bs = one_linear(k1)
        wt, bt = one_linear(k2)
        return (ws, bs, wt, bt)
    return one_linear(key)


# ---------------------------------------------------------------------------
# Pure-JAX reference (unfolded math, for correctness checking only)
# ---------------------------------------------------------------------------
def reference_forward(
    past_target, past_observed_values, params, *, model_type, individual, pred_len,
    kernel_size=DLINEAR_KERNEL_SIZE,
):
    del past_observed_values
    squeeze_channel = past_target.ndim == 2
    x = past_target[..., None] if squeeze_channel else past_target

    def mavg(v):
        pad = (kernel_size - 1) // 2
        front = jnp.repeat(v[:, :1], pad, axis=1)
        end = jnp.repeat(v[:, -1:], pad, axis=1)
        vp = jnp.concatenate([front, v, end], axis=1)
        windows = jnp.stack(
            [vp[:, k : k + v.shape[1]] for k in range(kernel_size)], axis=0
        )
        return jnp.sum(windows, axis=0) / float(kernel_size)

    def lin(w, b, v):
        if individual:
            return jnp.einsum("dpl,bld->bpd", w, v) + b[None]          # b is [P, D]
        return jnp.einsum("pl,bld->bpd", w, v) + b.reshape(1, -1, 1)   # b is [P, 1]

    if model_type == "nlinear":
        last = x[:, -1:, :]
        y = lin(params[0], params[1], x - last) + last
    elif model_type == "dlinear":
        trend = mavg(x)
        y = lin(params[0], params[1], x - trend) + lin(params[2], params[3], trend)
    else:
        y = lin(params[0], params[1], x)

    if squeeze_channel:
        y = y[..., 0]
    return y[:, None]


# ---------------------------------------------------------------------------
if __name__ == "__main__":
    key = jax.random.PRNGKey(0)
    CONTEXT_LEN, PRED_LEN = 16, 8

    def run_case(model_type, individual, target_dim, batch, kx, kp, num_batch_tiles=None):
        in_shape = (
            (batch, CONTEXT_LEN) if target_dim == 1 else (batch, CONTEXT_LEN, target_dim)
        )
        past_target = jax.random.normal(kx, in_shape, jnp.float32)
        past_observed = jnp.ones(in_shape, jnp.float32)
        params = make_params(kp, model_type, CONTEXT_LEN, PRED_LEN, target_dim, individual)

        # Hoisted prep: fold + Kronecker/block expansion happens once, not per forward.
        kparams = prepare_kernel_params(
            params, model_type=model_type, individual=individual,
            seq_len=CONTEXT_LEN, pred_len=PRED_LEN, n_ch=target_dim,
        )

        out = linear_family_forward(
            past_target, past_observed, kparams,
            pred_len=PRED_LEN, target_dim=target_dim, num_batch_tiles=num_batch_tiles,
        )
        out = jax.block_until_ready(out)

        ref = reference_forward(
            past_target, past_observed, params,
            model_type=model_type, individual=individual, pred_len=PRED_LEN,
        )
        expected_shape = (
            (batch, 1, PRED_LEN) if target_dim == 1 else (batch, 1, PRED_LEN, target_dim)
        )
        assert out.shape == expected_shape, (model_type, out.shape, expected_shape)
        assert jnp.allclose(out, ref, atol=1e-4, rtol=1e-4), (
            model_type, individual, float(jnp.max(jnp.abs(out - ref)))
        )

    # Small-shape sanity: all model types, shared & individual, scalar-target path,
    # and an "individual" channel count (32) that the old lane-packing rule mishandled.
    small_cases = [
        ("linear", False, 4),
        ("nlinear", False, 4),
        ("dlinear", False, 4),
        ("dlinear", True, 4),
        ("nlinear", False, 1),   # target_dim == 1 (scalar target) path
        ("linear", True, 32),    # general channel count, block-diagonal weight
    ]
    for model_type, individual, target_dim in small_cases:
        key, kx, kp = jax.random.split(key, 3)
        run_case(model_type, individual, target_dim, 2, kx, kp)

    # Larger batch: auto tiling (1 tile on v5e/v6e, 2 parallel tiles on v7x).
    key, kx, kp = jax.random.split(key, 3)
    run_case("nlinear", False, 4, 1200, kx, kp)

    # Forced multi-tile grids: even split, and a ragged tail (partial last block).
    key, kx, kp = jax.random.split(key, 3)
    run_case("dlinear", True, 4, 1200, kx, kp, num_batch_tiles=3)
    key, kx, kp = jax.random.split(key, 3)
    run_case("linear", False, 4, 1200, kx, kp, num_batch_tiles=7)

    # TODO(synk): .loss() (masked MSE + weighted_average) is training-only and not part of
    # the forward pass; it is intentionally not implemented as a kernel.
    print("KERNEL_OK")
</pallas_src>

<mosaic_0001>
module attributes {stable_mosaic.version = 11 : i64} {
  func.func @_linear_kernel(%arg0: i32, %arg1: memref<64x32xf32, #tpu.memory_space<vmem>>, %arg2: memref<1x32xf32, #tpu.memory_space<vmem>>, %arg3: memref<2x64xf32, #tpu.memory_space<vmem>>, %arg4: memref<2x32xf32, #tpu.memory_space<vmem>>) attributes {dimension_semantics = [#tpu.dimension_semantics<parallel>], iteration_bounds = array<i64: 1>, scalar_prefetch = 0 : i64, scratch_operands = 0 : i64, tpu.core_type = #tpu.core_type<tc>, window_params = [{pipeline_mode = #tpu.pipeline_mode<synchronous>, transform_indices = @transform_0, window_bounds = array<i64: 64, 32>}, {pipeline_mode = #tpu.pipeline_mode<synchronous>, transform_indices = @transform_1, window_bounds = array<i64: 1, 32>}, {transform_indices = @transform_2, window_bounds = array<i64: 2, 64>}, {transform_indices = @transform_3, window_bounds = array<i64: 2, 32>}]} {
    %c0 = arith.constant 0 : index
    %c0_0 = arith.constant 0 : index
    %0 = vector.load %arg3[%c0, %c0_0] : memref<2x64xf32, #tpu.memory_space<vmem>>, vector<2x64xf32>
    %c0_1 = arith.constant 0 : index
    %c0_2 = arith.constant 0 : index
    %1 = vector.load %arg1[%c0_1, %c0_2] : memref<64x32xf32, #tpu.memory_space<vmem>>, vector<64x32xf32>
    %cst = arith.constant dense<0.000000e+00> : vector<2x32xf32>
    %2 = tpu.matmul %0, %1, %cst {dimension_numbers = #tpu.dot_dimension_numbers<[1], [0], [0], [1], [0, 0, 1, 1], [], []>} : vector<2x64xf32>, vector<64x32xf32>, vector<2x32xf32> -> vector<2x32xf32>
    %c0_3 = arith.constant 0 : index
    %c0_4 = arith.constant 0 : index
    %3 = vector.load %arg2[%c0_3, %c0_4] : memref<1x32xf32, #tpu.memory_space<vmem>>, vector<1x32xf32>
    %4 = vector.broadcast %3 : vector<1x32xf32> to vector<2x32xf32>
    %5 = arith.addf %2, %4 : vector<2x32xf32>
    %c0_5 = arith.constant 0 : index
    %c0_6 = arith.constant 0 : index
    %6 = vector.load %arg4[%c0_5, %c0_6] : memref<2x32xf32, #tpu.memory_space<vmem>>, vector<2x32xf32>
    tpu.vector_store %arg4[%c0_5, %c0_6], %5 {strides = array<i32>} : memref<2x32xf32, #tpu.memory_space<vmem>>, vector<2x32xf32>,
    return
  }
  func.func @transform_0(%arg0: i32) -> (i32, i32) {
    %c0_i32 = arith.constant 0 : i32
    %c0_i32_0 = arith.constant 0 : i32
    %c0_i32_1 = arith.constant 0 : i32
    return %c0_i32, %c0_i32_0 : i32, i32
  }
  func.func @transform_1(%arg0: i32) -> (i32, i32) {
    %c0_i32 = arith.constant 0 : i32
    %c0_i32_0 = arith.constant 0 : i32
    %c0_i32_1 = arith.constant 0 : i32
    return %c0_i32, %c0_i32_0 : i32, i32
  }
  func.func @transform_2(%arg0: i32) -> (i32, i32) {
    %c0_i32 = arith.constant 0 : i32
    %c0_i32_0 = arith.constant 0 : i32
    return %arg0, %c0_i32 : i32, i32
  }
  func.func @transform_3(%arg0: i32) -> (i32, i32) {
    %c0_i32 = arith.constant 0 : i32
    %c0_i32_0 = arith.constant 0 : i32
    return %arg0, %c0_i32 : i32, i32
  }
}

</mosaic_0001>

<bundles_post_ra>
// kernel: linear_family_forward.1
= control target key start
LH: loop header
LB: loop body
LE: loop exit
PB: predicated region body
PF: predicated region fallthrough
CT: control target
= control target key end

     0   :  { %v155_v0 = vmov 0.0|0.0   ;;  %vm156_vm0 = vmmov 0   ;;  %v157_v4 = vmov 0.0   ;;  %vm30_vm1 = vcmask 523264   ;;  %s211_s0 = inlined_call_operand.vmem [shape: f32[64,32], index: 0, kind: input, shape index: {}]   ;;  %s212_s2 = inlined_call_operand.vmem [shape: f32[2,64], index: 2, kind: input, shape index: {}]   ;;  %s213_s1 = inlined_call_operand.vmem [shape: f32[1,32], index: 1, kind: input, shape index: {}]   ;;  %s214_s3 = inlined_call_operand.vmem [shape: f32[2,32], index: 3, kind: output, shape index: {}]  }
   0x1   :  { %140 = vmatprep.subr.bf16.mxu0 %v155_v0  ;;  %v15_v1 = vld [vmem:[%s211_s0] sm:$0xff]  ;;  %v16_v2 = vld [vmem:[%s211_s0 + $0x8] sm:$0xff]  ;;  %v17_v3 = vld [vmem:[%s211_s0 + $0x10] sm:$0xff]  ;;  %137 = vmatprep.mubr.msk.f32.mxu0 %vm156_vm0, %v157_v4  ;;  %vm104_vm2 = vcmask 254976  }
   0x2   :  { %v141_v5 = vpack.c.bf16 %v16_v2, %v15_v1  ;;  %v18_v6 = vld [vmem:[%s211_s0 + $0x18] sm:$0xff]  ;;  %v19_v8 = vld [vmem:[%s211_s0 + $0x20] sm:$0xff]  ;;  %v20_v9 = vld [vmem:[%s211_s0 + $0x28] sm:$0xff] }
   0x3   :  { %v144_v7 = vpack.c.bf16 %v18_v6, %v17_v3  ;;  %v147_v10 = vpack.c.bf16 %v20_v9, %v19_v8  ;;  %v21_v11 = vld [vmem:[%s211_s0 + $0x30] sm:$0xff]  ;;  %v22_v12 = vld [vmem:[%s211_s0 + $0x38] sm:$0xff]  ;;  %v14_v14 = vld [vmem:[%s212_s2] sm:$0x3] }
   0x4   :  { %142 = vmatpush3.bf16.msra.mxu0 %v141_v5  ;;  %v150_v13 = vpack.c.bf16 %v22_v12, %v21_v11  ;;  %v110_v15 = vld [vmem:[%s213_s1] ss:$0 sm:$0xff] }
   0x5   :  { %143 = vmatprep.subr.bf16.mxu0 %v155_v0 }
   0x8   :  { %145 = vmatpush3.bf16.msra.mxu0 %v144_v7 }
   0x9   :  { %146 = vmatprep.subr.bf16.mxu0 %v155_v0 }
   0xc   :  { %148 = vmatpush3.bf16.msra.mxu0 %v147_v10 }
   0xd   :  { %149 = vmatprep.subr.bf16.mxu0 %v155_v0 }
  0x10   :  { %151 = vmatpush3.bf16.msra.mxu0 %v150_v13 }
  0x13   :  { %138 = vmatmul.mubr.msk.f32.vlgmr.msra.gmra.mrb[0].mxu0 %vm30_vm1, %v14_v14 }
  0xe6   :  { %v100_v16 = vpop.f32.mrb[0].mxu0 }
  0xe7   :  { %v101_v17 = vadd.f32 %v110_v15, %v100_v16  ;;  %v139_v18 = vpop.f32.mrb[1].mxu0 }
  0xe9   :  { %105 = vst.msk [vmem:[%s214_s3] sm:$0x3] %vm104_vm2, %v101_v17 }

</bundles_post_ra>
